<compile_context>
chip_gen: v7x
topology: tpu7x:2x2x1
jax: 0.10.0
libtpu: 0.0.40
codegen_flags: <defaults>
</compile_context>

<pallas_src>
import jax
import jax.numpy as jnp
from jax.experimental import pallas as pl
from jax.experimental.pallas import tpu as pltpu

# Logical dims (match the PyTorch module).
EMBED_DIM = 250
H1_DIM = 320
H2_DIM = 160
NUM_CLASSES = 4

# Lane-padded width of the folded weight's output axis (4 -> 128).
OUT_LANES = 128


def _round_up(n, m):
    return ((n + m - 1) // m) * m


def _choose_batch_tile(batch):
    """Adaptive batch tile (Python/trace-time).

    Small batches: one tile rounded to the 8-row sublane granule.
    Large batches: 1-2K-row tiles (amortize ~0.35us/grid-step overhead),
    capped so the grid keeps >= 2 steps for v7x's two TensorCores.
    """
    if batch <= 1024:
        return max(8, _round_up(batch, 8))
    tile = _round_up(pl.cdiv(batch, 2), 256)
    return min(2048, tile)


def _classifier_kernel(x_ref, wc_ref, bc_ref, o_ref):
    """Fused forward: x @ Wc + bc (folded 3-layer head, no activation).

    x_ref : (TB, 250) f32   -- cast to bf16 in-kernel (no wrapper pad/cast pass)
    wc_ref: (250, 128) bf16 -- folded W1@W2@W3, columns 4..127 are zero
    bc_ref: (1, 128) f32    -- folded bias, lanes 4..127 are zero
    o_ref : (TB, 4) f32     -- narrow output (masked vst, tiny writeback)
    """
    x = x_ref[...].astype(jnp.bfloat16)                                # (TB, 250)
    h = jnp.dot(x, wc_ref[...], preferred_element_type=jnp.float32)   # (TB, 128) f32
    h = h + bc_ref[...]                                                # f32 bias add
    o_ref[...] = h[:, :NUM_CLASSES].astype(o_ref.dtype)                # (TB, 4)


@jax.jit
def classifier_forward(x, wc, bc):
    """x: (B, 250) f32; wc: (250, 128) bf16 folded; bc: (1, 128) f32 folded.
    Returns (B, 4) f32."""
    batch, embed = x.shape
    assert embed == EMBED_DIM, embed

    tb = _choose_batch_tile(batch)
    padded_batch = _round_up(batch, tb)
    if padded_batch != batch:
        # Only the (rare) row padding; no feature pad, no dtype cast.
        x = jnp.pad(x, ((0, padded_batch - batch), (0, 0)))

    grid = (padded_batch // tb,)

    flops = 2 * padded_batch * EMBED_DIM * OUT_LANES
    bytes_accessed = (padded_batch * EMBED_DIM * 4        # x (f32)
                      + EMBED_DIM * OUT_LANES * 2         # Wc (bf16)
                      + OUT_LANES * 4                     # bc (f32)
                      + padded_batch * NUM_CLASSES * 4)   # out (f32)

    out = pl.pallas_call(
        _classifier_kernel,
        out_shape=jax.ShapeDtypeStruct((padded_batch, NUM_CLASSES), jnp.float32),
        grid=grid,
        in_specs=[
            pl.BlockSpec((tb, EMBED_DIM), lambda i: (i, 0)),         # x tile
            pl.BlockSpec((EMBED_DIM, OUT_LANES), lambda i: (0, 0)),  # Wc (resident)
            pl.BlockSpec((1, OUT_LANES), lambda i: (0, 0)),          # bc (resident)
        ],
        out_specs=pl.BlockSpec((tb, NUM_CLASSES), lambda i: (i, 0)),
        compiler_params=pltpu.CompilerParams(
            dimension_semantics=("parallel",)),
        cost_estimate=pl.CostEstimate(flops=flops, transcendentals=0,
                                      bytes_accessed=bytes_accessed),
    )(x, wc, bc)

    if padded_batch != batch:
        out = out[:batch]
    return out


def init_logical_params(key, embed_dim=EMBED_DIM, num_classes=NUM_CLASSES):
    """nn.Linear-style U(-1/sqrt(fan_in), 1/sqrt(fan_in)) init, (in, out) layout.

    NOTE: values won't bit-match a PyTorch checkpoint (different RNG / layout),
    but shapes and forward semantics match y = x @ W_pt.T + b exactly.
    """
    dims = [(embed_dim, H1_DIM), (H1_DIM, H2_DIM), (H2_DIM, num_classes)]
    params = []
    for i, (fan_in, fan_out) in enumerate(dims):
        kw, kb = jax.random.split(jax.random.fold_in(key, i))
        bound = 1.0 / jnp.sqrt(float(fan_in))
        w = jax.random.uniform(kw, (fan_in, fan_out), jnp.float32, -bound, bound)
        b = jax.random.uniform(kb, (1, fan_out), jnp.float32, -bound, bound)
        params += [w, b]
    return tuple(params)  # (w1, b1, w2, b2, w3, b3)


def fold_params_for_kernel(w1, b1, w2, b2, w3, b3):
    """Fold the activation-free 3-layer head into one affine map.

    Computed once in f32 (HIGHEST precision), cast to bf16 at the very end to
    avoid compounding rounding; the 4 output columns are zero-padded to 128
    lanes for a full-vreg MXU result.
    """
    hp = jax.lax.Precision.HIGHEST
    wc = jnp.dot(jnp.dot(w1, w2, precision=hp), w3, precision=hp)            # (250, 4) f32
    bc = jnp.dot(jnp.dot(b1, w2, precision=hp) + b2, w3, precision=hp) + b3  # (1, 4)  f32
    pad = OUT_LANES - NUM_CLASSES
    wc = jnp.pad(wc, ((0, 0), (0, pad))).astype(jnp.bfloat16)
    bc = jnp.pad(bc, ((0, 0), (0, pad))).astype(jnp.float32)
    return wc, bc


def reference_forward(x, w1, b1, w2, b2, w3, b3):
    """Plain-JAX f32 reference matching the PyTorch layered forward."""
    hp = jax.lax.Precision.HIGHEST
    h = jnp.dot(x, w1, precision=hp) + b1
    h = jnp.dot(h, w2, precision=hp) + b2
    return jnp.dot(h, w3, precision=hp) + b3


if __name__ == "__main__":
    key = jax.random.PRNGKey(0)
    k_x, k_p = jax.random.split(key)

    logical = init_logical_params(k_p)
    wc, bc = fold_params_for_kernel(*logical)

    # Primary small-batch case (one 8-row tile, no padding anywhere).
    batch = 8
    x = jax.random.normal(k_x, (batch, EMBED_DIM), jnp.float32)
    out = jax.block_until_ready(classifier_forward(x, wc, bc))
    ref = reference_forward(x, *logical)
    assert out.shape == (batch, NUM_CLASSES), out.shape
    max_diff = float(jnp.max(jnp.abs(out - ref)))
    assert jnp.allclose(out, ref, atol=1e-2, rtol=1e-2), f"max abs diff {max_diff}"

    # Exercise the row-padding / row-slicing path (batch not a multiple of 8).
    batch2 = 37
    x2 = jax.random.normal(jax.random.fold_in(k_x, 1), (batch2, EMBED_DIM),
                           jnp.float32)
    out2 = jax.block_until_ready(classifier_forward(x2, wc, bc))
    ref2 = reference_forward(x2, *logical)
    assert out2.shape == (batch2, NUM_CLASSES), out2.shape
    max_diff2 = float(jnp.max(jnp.abs(out2 - ref2)))
    assert jnp.allclose(out2, ref2, atol=1e-2, rtol=1e-2), f"max abs diff {max_diff2}"

    print("KERNEL_OK")
</pallas_src>

<mosaic_0001>
module attributes {stable_mosaic.version = 11 : i64} {
  func.func @_classifier_kernel(%arg0: i32, %arg1: memref<8x250xf32, #tpu.memory_space<vmem>>, %arg2: memref<250x128xbf16, #tpu.memory_space<vmem>>, %arg3: memref<1x128xf32, #tpu.memory_space<vmem>>, %arg4: memref<8x4xf32, #tpu.memory_space<vmem>>) attributes {dimension_semantics = [#tpu.dimension_semantics<parallel>], iteration_bounds = array<i64: 1>, scalar_prefetch = 0 : i64, scratch_operands = 0 : i64, tpu.core_type = #tpu.core_type<tc>, window_params = [{transform_indices = @transform_0, window_bounds = array<i64: 8, 250>}, {pipeline_mode = #tpu.pipeline_mode<synchronous>, transform_indices = @transform_1, window_bounds = array<i64: 250, 128>}, {pipeline_mode = #tpu.pipeline_mode<synchronous>, transform_indices = @transform_2, window_bounds = array<i64: 1, 128>}, {transform_indices = @transform_3, window_bounds = array<i64: 8, 4>}]} {
    %c0 = arith.constant 0 : index
    %c0_0 = arith.constant 0 : index
    %0 = vector.load %arg1[%c0, %c0_0] : memref<8x250xf32, #tpu.memory_space<vmem>>, vector<8x250xf32>
    %1 = arith.truncf %0 : vector<8x250xf32> to vector<8x250xbf16>
    %c0_1 = arith.constant 0 : index
    %c0_2 = arith.constant 0 : index
    %2 = vector.load %arg2[%c0_1, %c0_2] : memref<250x128xbf16, #tpu.memory_space<vmem>>, vector<250x128xbf16>
    %cst = arith.constant dense<0.000000e+00> : vector<8x128xf32>
    %3 = tpu.matmul %1, %2, %cst {dimension_numbers = #tpu.dot_dimension_numbers<[1], [0], [0], [1], [0, 0, 1, 1], [], []>} : vector<8x250xbf16>, vector<250x128xbf16>, vector<8x128xf32> -> vector<8x128xf32>
    %c0_3 = arith.constant 0 : index
    %c0_4 = arith.constant 0 : index
    %4 = vector.load %arg3[%c0_3, %c0_4] : memref<1x128xf32, #tpu.memory_space<vmem>>, vector<1x128xf32>
    %5 = vector.broadcast %4 : vector<1x128xf32> to vector<8x128xf32>
    %6 = arith.addf %3, %5 : vector<8x128xf32>
    %7 = vector.extract_strided_slice %6 {offsets = [0, 0], sizes = [8, 4], strides = [1, 1]} : vector<8x128xf32> to vector<8x4xf32>
    %c0_5 = arith.constant 0 : index
    %c0_6 = arith.constant 0 : index
    %8 = vector.load %arg4[%c0_5, %c0_6] : memref<8x4xf32, #tpu.memory_space<vmem>>, vector<8x4xf32>
    tpu.vector_store %arg4[%c0_5, %c0_6], %7 {strides = array<i32>} : memref<8x4xf32, #tpu.memory_space<vmem>>, vector<8x4xf32>,
    return
  }
  func.func @transform_0(%arg0: i32) -> (i32, i32) {
    %c0_i32 = arith.constant 0 : i32
    %c0_i32_0 = arith.constant 0 : i32
    return %arg0, %c0_i32 : i32, i32
  }
  func.func @transform_1(%arg0: i32) -> (i32, i32) {
    %c0_i32 = arith.constant 0 : i32
    %c0_i32_0 = arith.constant 0 : i32
    %c0_i32_1 = arith.constant 0 : i32
    return %c0_i32, %c0_i32_0 : i32, i32
  }
  func.func @transform_2(%arg0: i32) -> (i32, i32) {
    %c0_i32 = arith.constant 0 : i32
    %c0_i32_0 = arith.constant 0 : i32
    %c0_i32_1 = arith.constant 0 : i32
    return %c0_i32, %c0_i32_0 : i32, i32
  }
  func.func @transform_3(%arg0: i32) -> (i32, i32) {
    %c0_i32 = arith.constant 0 : i32
    %c0_i32_0 = arith.constant 0 : i32
    return %arg0, %c0_i32 : i32, i32
  }
}

</mosaic_0001>

<bundles_post_ra>
// kernel: classifier_forward.1
= control target key start
LH: loop header
LB: loop body
LE: loop exit
PB: predicated region body
PF: predicated region fallthrough
CT: control target
= control target key end

     0   :  { %8 = vsyncpa [#allocation3], 0  ;;  %s405_s0 = inlined_call_operand.hbm [shape: f32[8,250], index: 0, kind: input, shape index: {}]   ;;  %s406_s1 = inlined_call_operand.hbm [shape: bf16[250,128], index: 1, kind: input, shape index: {}]   ;;  %s407_s2 = inlined_call_operand.vmem [shape: f32[1,128], index: 2, kind: input, shape index: {}]   ;;  %s408_s3 = inlined_call_operand.vmem [shape: f32[8,4], index: 3, kind: output, shape index: {}]  }
   0x1   :  { %9 = vsyncpa [#allocation5], 0  ;;  %s344_s12 = smov [#allocation2]   ;;  %s345_s14 = smov [#allocation4]  }
   0x2   :  { %s16_s13 = sshll.u32 %s344_s12, 4  ;;  %s25_s15 = sshll.u32 %s345_s14, 4  ;;  %s17_s13 = int_to_ptr.vmem [resolvable:$true] %s16_s13  ;;  %s368_s15 = int_to_ptr.vmem [resolvable:$true] %s25_s15 }
   0x3   :  { %s296_s18 = scalar_lea.hbm %s405_s0, 256 }
   0x4   :  { %p297_p0 = scmp.ne.s32.totalorder %s405_s0, %s296_s18  ;;  %p300_p1 = scmp.lt.u32.totalorder %s296_s18, %s405_s0 }
   0x6   :  { %p302_p2 = pnand %p300_p1, %p297_p0 }
   0x8   :  { %305 = shalt.err (!%p302_p2)
}
   0x9   :  { %s306_s23 = scalar_lea.vmem %s17_s13, 256  ;;  %p311_p4 = scmp.lt.s32.totalorder %s17_s13, %s17_s13 }
   0xa   :  { %p307_p3 = scmp.ne.s32.totalorder %s17_s13, %s306_s23  ;;  %p312_p5 = scmp.lt.s32.totalorder %s306_s23, %s306_s23 }
   0xc   :  { %p313_p6 = por %p312_p5, %p311_p4 }
   0xe   :  { %p314_p7 = pnand %p313_p6, %p307_p3 }
  0x10   :  { %317 = shalt.err (!%p314_p7)
}
  0x11   :  { %19 = dma.hbm_to_vmem [thread:$0]  %s405_s0, 256, %s17_s13, [#allocation3]  }
  0x12   :  { %s318_s28 = scalar_lea.hbm %s406_s1, 2048 }
  0x13   :  { %p319_p8 = scmp.ne.s32.totalorder %s406_s1, %s318_s28  ;;  %p322_p9 = scmp.lt.u32.totalorder %s318_s28, %s406_s1 }
  0x15   :  { %p324_p10 = pnand %p322_p9, %p319_p8 }
  0x17   :  { %327 = shalt.err (!%p324_p10)
}
  0x18   :  { %s328_s6 = scalar_lea.vmem %s368_s15, 2048  ;;  %p333_p12 = scmp.lt.s32.totalorder %s368_s15, %s368_s15 }
  0x19   :  { %p329_p11 = scmp.ne.s32.totalorder %s368_s15, %s328_s6  ;;  %p334_p13 = scmp.lt.s32.totalorder %s328_s6, %s328_s6 }
  0x1b   :  { %p335_p0 = por %p334_p13, %p333_p12 }
  0x1d   :  { %p336_p1 = pnand %p335_p0, %p329_p11 }
  0x1f   :  { %339 = shalt.err (!%p336_p1)
}
  0x20   :  { %s346_s0 = smov 64   ;;  %s347_s7 = smov 4  }
  0x21   :  { %31 = dma.hbm_to_vmem [thread:$0]  %s406_s1, 2048, %s368_s15, [#allocation5], %s346_s0, %s346_s0, %s347_s7  }
  0x22   :  { %340 = dma.done.wait [#allocation3], 256  }
  0x23   :  { %341 = vsyncadd [#allocation3], 4294967040 }
  0x24   :  { %342 = dma.done.wait [#allocation5], 2048  }
  0x25   :  { %343 = vsyncadd [#allocation5], 4294965248  ;;  %v280_v0 = vld [vmem:[#allocation4 + $0x40] sm:$0xff]   ;;  %v282_v2 = vld [vmem:[#allocation4 + $0x48] sm:$0xff]   ;;  %vm179_vm0 = vcmask 998400   ;;  %vm183_vm1 = vcmask 1044480  }
  0x26   :  { %v281_v1 = vld [vmem:[#allocation4] sm:$0xff]   ;;  %253 = vmatprep.subr.bf16.mxu0 %v280_v0  ;;  %v283_v3 = vld [vmem:[#allocation4 + $0x8] sm:$0xff]   ;;  %v284_v4 = vld [vmem:[#allocation4 + $0x50] sm:$0xff]   ;;  %vm227_vm2 = vcmask 31744  }
  0x27   :  { %254 = vmatpush3.bf16.msra.mxu0 %v281_v1  ;;  %v285_v5 = vld [vmem:[#allocation4 + $0x10] sm:$0xff]   ;;  %v286_v6 = vld [vmem:[#allocation4 + $0x58] sm:$0xff]   ;;  %v288_v8 = vld [vmem:[#allocation4 + $0x60] sm:$0xff]  }
  0x28   :  { %255 = vmatprep.subr.bf16.mxu0 %v282_v2  ;;  %v287_v7 = vld [vmem:[#allocation4 + $0x18] sm:$0xff]   ;;  %v289_v9 = vld [vmem:[#allocation4 + $0x20] sm:$0xff]   ;;  %v290_v10 = vld [vmem:[#allocation4 + $0x68] sm:$0xff]  }
  0x29   :  { %v42_v11 = vld [vmem:[#allocation2 + $0x8] sm:$0xff]  ;;  %v291_v13 = vld [vmem:[#allocation4 + $0x28] sm:$0xff]   ;;  %v292_v14 = vld [vmem:[#allocation4 + $0x70] sm:$0xff]  }
  0x2a   :  { %v44_v12 = vpack.c.bf16 %v42_v11, %v42_v11  ;;  %v293_v15 = vld [vmem:[#allocation4 + $0x30] sm:$0xff]   ;;  %v294_v16 = vld [vmem:[#allocation4 + $0x78] sm:$0x1f]   ;;  %v235_v21 = vld [vmem:[%s407_s2] ss:$0 sm:$0xff] }
  0x2b   :  { %256 = vmatpush3.bf16.msra.mxu0 %v283_v3  ;;  %v295_v17 = vld [vmem:[#allocation4 + $0x38] sm:$0xff]   ;;  %v41_v18 = vld [vmem:[#allocation2] sm:$0xff] }
  0x2c   :  { %257 = vmatprep.subr.bf16.mxu0 %v284_v4  ;;  %252 = vmatprep.mubr.msk.bf16.mxu0 %vm179_vm0, %v44_v12  ;;  %v43_v19 = vpack.c.bf16 %v41_v18, %v41_v18 }
  0x2f   :  { %258 = vmatpush3.bf16.msra.mxu0 %v285_v5 }
  0x30   :  { %259 = vmatprep.subr.bf16.mxu0 %v286_v6 }
  0x33   :  { %260 = vmatpush3.bf16.msra.mxu0 %v287_v7 }
  0x34   :  { %261 = vmatprep.subr.bf16.mxu0 %v288_v8 }
  0x37   :  { %262 = vmatpush3.bf16.msra.mxu0 %v289_v9 }
  0x38   :  { %263 = vmatprep.subr.bf16.mxu0 %v290_v10 }
  0x3b   :  { %264 = vmatpush3.bf16.msra.mxu0 %v291_v13 }
  0x3c   :  { %265 = vmatprep.subr.bf16.mxu0 %v292_v14 }
  0x3f   :  { %266 = vmatpush3.bf16.msra.mxu0 %v293_v15 }
  0x40   :  { %275 = vmatprep.subr.msk.bf16.mxu0 %vm183_vm1, %v294_v16 }
  0x43   :  { %268 = vmatpush3.bf16.msra.mxu0 %v295_v17 }
  0x46   :  { %220 = vmatmul.mubr.bf16.vlgmr.msra.gmra.mrb[0].mxu0 %v43_v19 }
 0x119   :  { %v269_v20 = vpop.f32.mrb[0].mxu0 }
 0x11a   :  { %v270_v22 = vpop.f32.mrb[1].mxu0 }
 0x11b   :  { %v271_v23 = vadd.f32 %v270_v22, %v269_v20  ;;  %v272_v24 = vpop.f32.mrb[2].mxu0 }
 0x11c   :  { %v273_v25 = vpop.f32.mrb[3].mxu0 }
 0x11d   :  { %v222_v26 = vadd.f32 %v271_v23, %v235_v21 }
 0x11f   :  { %228 = vst.msk [vmem:[%s408_s3] sm:$0xff] %vm227_vm2, %v222_v26 }
 0x120   :  { %233 = vsyncpa [#allocation3], 1 }
 0x121   :  { %234 = vsyncpa [#allocation5], 1 }

</bundles_post_ra>
